<compile_context>
chip_gen: v7x
topology: tpu7x:2x2x1
jax: 0.10.0
libtpu: 0.0.40
codegen_flags: <defaults>
</compile_context>

<pallas_src>
import functools

import jax
import jax.numpy as jnp
from jax.experimental import pallas as pl
from jax.experimental.pallas import tpu as pltpu

POWER = 3  # matches PowerReLU(power=3) default


def _power_relu_kernel(x_ref, o_ref, *, power, compute_f32):
    x = x_ref[...]
    if compute_f32 and x.dtype != jnp.float32:
        # Older chips (v5e and before) have no bf16 VALU path.
        x = x.astype(jnp.float32)
    r = jnp.maximum(x, 0)
    out = r
    for _ in range(power - 1):      # integer power via repeated multiply (VPU)
        out = out * r
    o_ref[...] = out.astype(o_ref.dtype)


def _chip_config():
    """Returns (target_tile_bytes, compute_sub_f32_in_f32) for this TPU."""
    kind = ""
    try:
        kind = jax.devices()[0].device_kind.lower()
    except Exception:  # pragma: no cover - defensive; default is safe anywhere
        pass
    old_gen = any(t in kind for t in ("v2", "v3", "v4", "v5"))
    target_tile_bytes = (2 << 20) if old_gen else (4 << 20)
    return target_tile_bytes, old_gen


def _choose_tiling(rows, width, itemsize, target_tile_bytes):
    """Pick (tile_rows, grid_rows) for a (rows, width) slab."""
    total_bytes = rows * width * itemsize
    tile_rows = max(1, target_tile_bytes // (width * itemsize))
    # Multiple of 32 covers the minimum sublane tile for f32/bf16/int8/fp8.
    tile_rows = max(32, (tile_rows // 32) * 32)
    # For tensors worth splitting (>~1 MiB) cap the tile so the grid has at
    # least 2 steps -> both v7x TensorCores get work under "parallel".
    if total_bytes > (1 << 20) and rows >= 64:
        half_rows = (rows // 2 // 32) * 32
        if half_rows >= 32:
            tile_rows = min(tile_rows, half_rows)
    if tile_rows >= rows:
        return rows, 1                       # full-dim block: always legal
    grid_rows = pl.cdiv(rows, tile_rows)     # ragged tail block is masked
    # Prefer an even grid so the 2-TensorCore split on v7x is balanced.
    if grid_rows % 2 == 1:
        cand = ((pl.cdiv(rows, grid_rows + 1) + 31) // 32) * 32
        if 32 <= cand < rows and pl.cdiv(rows, cand) % 2 == 0:
            tile_rows = cand
            grid_rows = pl.cdiv(rows, cand)
    return tile_rows, grid_rows


def power_relu(x: jax.Array, *, power: int = POWER) -> jax.Array:
    orig_shape = x.shape
    orig_dtype = x.dtype
    total = x.size
    if total == 0:
        return x

    target_tile_bytes, compute_f32 = _chip_config()
    kernel = functools.partial(
        _power_relu_kernel, power=power, compute_f32=compute_f32)

    x_flat = jnp.ravel(x)

    # Widest lane dimension (multiple of 128) that divides the element count.
    width = next((w for w in (4096, 2048, 1024, 512, 256, 128)
                  if total % w == 0), None)

    tail_out = None
    if width is None:
        # Bulk + remainder split: kernel streams the lane-aligned bulk; the
        # (<width)-element tail goes through plain jnp (negligible), so there
        # is no full-tensor pad or slice pass.
        width = 512
        bulk = (total // width) * width
        if bulk == 0:
            # Smaller than one lane row: plain jnp is already optimal.
            r = jnp.maximum(x_flat.astype(jnp.float32), 0.0)
            return (r ** power).astype(orig_dtype).reshape(orig_shape)
        tail = x_flat[bulk:]
        r = jnp.maximum(tail.astype(jnp.float32), 0.0)
        tail_out = (r ** power).astype(orig_dtype)
        x_flat = x_flat[:bulk]
        total = bulk

    rows = total // width
    itemsize = jnp.dtype(orig_dtype).itemsize
    tile_rows, grid_rows = _choose_tiling(rows, width, itemsize,
                                          target_tile_bytes)

    # in/out double-buffered => ~4 tile buffers live; add headroom, stay well
    # inside physical VMEM on every generation (v7x physical = 64 MiB).
    tile_vmem = tile_rows * width * itemsize
    vmem_limit = min(48 << 20, max(16 << 20, 4 * tile_vmem + (4 << 20)))

    out2d = pl.pallas_call(
        kernel,
        out_shape=jax.ShapeDtypeStruct((rows, width), orig_dtype),
        grid_spec=pltpu.PrefetchScalarGridSpec(
            num_scalar_prefetch=0,
            grid=(grid_rows,),
            in_specs=[pl.BlockSpec((tile_rows, width), lambda i: (i, 0))],
            out_specs=pl.BlockSpec((tile_rows, width), lambda i: (i, 0)),
        ),
        compiler_params=pltpu.CompilerParams(
            # Shards the grid across v7x's 2 TensorCores; harmless on
            # single-TC v5e/v6e.
            dimension_semantics=("parallel",),
            vmem_limit_bytes=vmem_limit,
        ),
    )(x_flat.reshape(rows, width))

    out_flat = out2d.reshape(-1)
    if tail_out is not None:
        out_flat = jnp.concatenate([out_flat, tail_out])
    return out_flat.reshape(orig_shape)


if __name__ == "__main__":
    key = jax.random.PRNGKey(0)
    # NCHW input, small shapes (batch=2, channels=4, spatial=16)
    x = jax.random.normal(key, (2, 4, 16, 16), dtype=jnp.float32)

    y = power_relu(x)
    jax.block_until_ready(y)

    # reference check (plain JAX)
    y_ref = jnp.power(jnp.maximum(x, 0.0), POWER)
    assert y.shape == x.shape and y.dtype == x.dtype
    assert jnp.allclose(y, y_ref, atol=1e-6, rtol=1e-6)

    print("KERNEL_OK")
</pallas_src>

<mosaic_0001>
module attributes {stable_mosaic.version = 11 : i64} {
  func.func @_power_relu_kernel(%arg0: i32, %arg1: memref<1x2048xf32, #tpu.memory_space<vmem>>, %arg2: memref<1x2048xf32, #tpu.memory_space<vmem>>) attributes {dimension_semantics = [#tpu.dimension_semantics<parallel>], iteration_bounds = array<i64: 1>, scalar_prefetch = 0 : i64, scratch_operands = 0 : i64, tpu.core_type = #tpu.core_type<tc>, window_params = [{transform_indices = @transform_0, window_bounds = array<i64: 1, 2048>}, {transform_indices = @transform_1, window_bounds = array<i64: 1, 2048>}]} {
    %c0 = arith.constant 0 : index
    %c0_0 = arith.constant 0 : index
    %0 = vector.load %arg1[%c0, %c0_0] : memref<1x2048xf32, #tpu.memory_space<vmem>>, vector<1x2048xf32>
    %cst = arith.constant 0.000000e+00 : f32
    %1 = vector.broadcast %cst : f32 to vector<1x2048xf32>
    %2 = arith.maximumf %0, %1 : vector<1x2048xf32>
    %3 = arith.mulf %2, %2 : vector<1x2048xf32>
    %4 = arith.mulf %3, %2 : vector<1x2048xf32>
    %c0_1 = arith.constant 0 : index
    %c0_2 = arith.constant 0 : index
    %5 = vector.load %arg2[%c0_1, %c0_2] : memref<1x2048xf32, #tpu.memory_space<vmem>>, vector<1x2048xf32>
    tpu.vector_store %arg2[%c0_1, %c0_2], %4 {strides = array<i32>} : memref<1x2048xf32, #tpu.memory_space<vmem>>, vector<1x2048xf32>,
    return
  }
  func.func @transform_0(%arg0: i32) -> (i32, i32) {
    %c0_i32 = arith.constant 0 : i32
    %c0_i32_0 = arith.constant 0 : i32
    return %arg0, %c0_i32 : i32, i32
  }
  func.func @transform_1(%arg0: i32) -> (i32, i32) {
    %c0_i32 = arith.constant 0 : i32
    %c0_i32_0 = arith.constant 0 : i32
    return %arg0, %c0_i32 : i32, i32
  }
}

</mosaic_0001>

<bundles_post_ra>
// kernel: tpu_custom_call.1
= control target key start
LH: loop header
LB: loop body
LE: loop exit
PB: predicated region body
PF: predicated region fallthrough
CT: control target
= control target key end

     0   :  { %6 = vsyncpa [#allocation3], 0  ;;  %s132_s0 = inlined_call_operand.hbm [shape: f32[1,2048], index: 0, kind: input, shape index: {}]   ;;  %s133_s1 = inlined_call_operand.hbm [shape: f32[1,2048], index: 1, kind: output, shape index: {}]  }
   0x1   :  { %7 = vsyncpa [#allocation4], 0  ;;  %s96_s6 = smov [#allocation2]   ;;  %s48_s10 = scalar_lea.hbm %s132_s0, 256 }
   0x2   :  { %s14_s7 = sshll.u32 %s96_s6, 4  ;;  %p49_p0 = scmp.ne.s32.totalorder %s132_s0, %s48_s10  ;;  %s15_s7 = int_to_ptr.vmem [resolvable:$true] %s14_s7 }
   0x3   :  { %p52_p1 = scmp.lt.u32.totalorder %s48_s10, %s132_s0 }
   0x5   :  { %p54_p2 = pnand %p52_p1, %p49_p0 }
   0x7   :  { %57 = shalt.err (!%p54_p2)
}
   0x8   :  { %s58_s15 = scalar_lea.vmem %s15_s7, 256  ;;  %p63_p4 = scmp.lt.s32.totalorder %s15_s7, %s15_s7 }
   0x9   :  { %p59_p3 = scmp.ne.s32.totalorder %s15_s7, %s58_s15  ;;  %p64_p5 = scmp.lt.s32.totalorder %s58_s15, %s58_s15 }
   0xb   :  { %p65_p6 = por %p64_p5, %p63_p4 }
   0xd   :  { %p66_p7 = pnand %p65_p6, %p59_p3 }
   0xf   :  { %69 = shalt.err (!%p66_p7)
}
  0x10   :  { %17 = dma.hbm_to_vmem [thread:$0]  %s132_s0, 256, %s15_s7, [#allocation3]  }
  0x11   :  { %92 = dma.done.wait [#allocation3], 256  }
  0x12   :  { %93 = vsyncadd [#allocation3], 4294967040  ;;  %v21_v0 = vld [vmem:[#allocation2] sm:$0xff]  ;;  %v22_v1 = vld [vmem:[#allocation2 + $0x8] sm:$0xff]  ;;  %s97_s18 = smov [#allocation5]  }
  0x13   :  { %v23_v2 = vmax.f32 %v21_v0, 0.0  ;;  %v24_v3 = vmax.f32 %v22_v1, 0.0  ;;  %s37_s19 = sshll.u32 %s97_s18, 4  ;;  %s38_s19 = int_to_ptr.vmem [resolvable:$true] %s37_s19 }
  0x14   :  { %s70_s20 = scalar_lea.vmem %s38_s19, 256  ;;  %p75_p9 = scmp.lt.s32.totalorder %s38_s19, %s38_s19 }
  0x15   :  { %v25_v4 = vmul.f32 %v23_v2, %v23_v2  ;;  %v26_v5 = vmul.f32 %v24_v3, %v24_v3  ;;  %p71_p8 = scmp.ne.s32.totalorder %s38_s19, %s70_s20  ;;  %p76_p10 = scmp.lt.s32.totalorder %s70_s20, %s70_s20 }
  0x17   :  { %v27_v6 = vmul.f32 %v25_v4, %v23_v2  ;;  %v28_v7 = vmul.f32 %v26_v5, %v24_v3  ;;  %p77_p11 = por %p76_p10, %p75_p9 }
  0x19   :  { %29 = vst [vmem:[#allocation5] sm:$0xff] %v27_v6  ;;  %30 = vst [vmem:[#allocation5 + $0x8] sm:$0xff] %v28_v7  ;;  %p78_p12 = pnand %p77_p11, %p71_p8 }
  0x1b   :  { %81 = shalt.err (!%p78_p12)
}
  0x1c   :  { %s82_s22 = scalar_lea.hbm %s133_s1, 256 }
  0x1d   :  { %p83_p13 = scmp.ne.s32.totalorder %s133_s1, %s82_s22  ;;  %p86_p0 = scmp.lt.u32.totalorder %s82_s22, %s133_s1 }
  0x1f   :  { %p88_p1 = pnand %p86_p0, %p83_p13 }
  0x21   :  { %91 = shalt.err (!%p88_p1)
}
  0x22   :  { %40 = dma.vmem_to_hbm [thread:$0]  %s38_s19, 256, %s133_s1, [#allocation4]  }
  0x23   :  { %94 = dma.done.wait [#allocation4], 256  }
  0x24   :  { %95 = vsyncadd [#allocation4], 4294967040 }
  0x25   :  { %44 = vsyncpa [#allocation3], 1 }
  0x26   :  { %45 = vsyncpa [#allocation4], 1 }

</bundles_post_ra>
